<compile_context>
chip_gen: v6e
topology: v6e:2x2x1
jax: 0.10.0
libtpu: 0.0.40
codegen_flags: <defaults>
</compile_context>

<pallas_src>
import functools

import jax
import jax.numpy as jnp
from jax.experimental import pallas as pl
from jax.experimental.pallas import tpu as pltpu


def _cnn1d_kernel(x_ref, w_ref, b_ref, o_ref, *, kernel_size1, kernel_size2):
    # x_ref: (C_in, N, L)       bf16 input, channel-major (shared, full block)
    # w_ref: (TC, K1, C_in)     bf16 BN-folded conv weight tile
    # b_ref: (TC, 1)            f32  BN-folded conv bias tile
    # o_ref: (TC, n_cols_pad)   f32  lane-dense pooled-output slab tile
    x = x_ref[...]                               # bf16; no full-slab f32 upcast
    w = w_ref[...]
    C_in, N, L = x.shape
    TC = w.shape[0]
    K1, K2 = kernel_size1, kernel_size2
    L_out = L - K1 + 1
    P_out = L_out // K2
    L_use = P_out * K2                           # only columns the pool keeps
    n_cols = N * P_out
    Ncols = N * L_use

    # Conv1d as K1 accumulating matmuls on static lane slices of x:
    # no im2col patch is materialized, only one bf16 copy of x, f32 accumulation.
    acc = jnp.zeros((TC, Ncols), jnp.float32)
    for k in range(K1):                          # K1 is small & static
        xk = x[:, :, k:k + L_use].reshape(C_in, Ncols)
        acc = acc + jnp.dot(w[:, k, :], xk, preferred_element_type=jnp.float32)

    # Bias + ReLU (BN already folded into w/b).
    acc = jnp.maximum(acc + b_ref[...], 0.0)

    # MaxPool1d(K2), floor mode (tail trimmed via L_use).
    pooled = jnp.max(acc.reshape(TC, n_cols, K2), axis=-1)      # (TC, n_cols)

    # Pad columns so the final store is a full-width (unmasked) vst.
    pad = o_ref.shape[1] - n_cols
    if pad:
        pooled = jnp.concatenate(
            [pooled, jnp.zeros((TC, pad), pooled.dtype)], axis=1)
    o_ref[...] = pooled.astype(o_ref.dtype)


def cnn1d_forward(x, w, b, gamma, beta, *, kernel_size1, kernel_size2, eps=1e-5):
    """x: (N, C_in, L), w: (C_out, C_in, K1), b/gamma/beta 1-D. Returns (N, C_out, P_out)."""
    N, C_in, L = x.shape
    C_out = w.shape[0]
    K1, K2 = kernel_size1, kernel_size2
    L_out = L - K1 + 1
    P_out = L_out // K2
    n_cols = N * P_out
    n_cols_pad = ((n_cols + 127) // 128) * 128

    # ---- Hoisted BatchNorm1d batch stats (training mode, biased variance).
    # Two-pass mean/var in f32 avoids the E[x^2]-E[x]^2 cancellation issue.
    xf = x.astype(jnp.float32)
    mean = jnp.mean(xf, axis=(0, 2))                               # (C_in,)
    var = jnp.mean((xf - mean[None, :, None]) ** 2, axis=(0, 2))   # (C_in,)
    scale = gamma.astype(jnp.float32) * jax.lax.rsqrt(var + eps)
    shift = beta.astype(jnp.float32) - mean * scale

    # ---- Fold BN into conv weights / bias (computed once, tiny).
    w_okc = jnp.transpose(w.astype(jnp.float32), (0, 2, 1))        # (C_out, K1, C_in)
    w_eff = w_okc * scale[None, None, :]
    b_eff = b.astype(jnp.float32) + jnp.einsum('okc,c->o', w_okc, shift)

    # Output-channel tiling: fill the MXU M dimension, shrink the grid.
    TC = min(128, ((C_out + 7) // 8) * 8)
    C_out_pad = ((C_out + TC - 1) // TC) * TC
    G = C_out_pad // TC

    # Layout plumbing (once, outside the kernel).
    x_cnl = jnp.transpose(x, (1, 0, 2)).astype(jnp.bfloat16)       # (C_in, N, L) bf16
    w_p = jnp.zeros((C_out_pad, K1, C_in), jnp.bfloat16).at[:C_out].set(
        w_eff.astype(jnp.bfloat16))
    b_p = jnp.zeros((C_out_pad, 1), jnp.float32).at[:C_out, 0].set(b_eff)

    kernel = functools.partial(_cnn1d_kernel,
                               kernel_size1=K1, kernel_size2=K2)

    out2 = pl.pallas_call(
        kernel,
        out_shape=jax.ShapeDtypeStruct((C_out_pad, n_cols_pad), jnp.float32),
        grid_spec=pltpu.PrefetchScalarGridSpec(
            num_scalar_prefetch=0,
            grid=(G,),
            in_specs=[
                pl.BlockSpec((C_in, N, L), lambda i: (0, 0, 0)),    # x (shared)
                pl.BlockSpec((TC, K1, C_in), lambda i: (i, 0, 0)),  # BN-folded w
                pl.BlockSpec((TC, 1), lambda i: (i, 0)),            # BN-folded b
            ],
            out_specs=pl.BlockSpec((TC, n_cols_pad), lambda i: (i, 0)),
        ),
        compiler_params=pltpu.CompilerParams(
            dimension_semantics=("parallel",),
            # Explicit limit mainly for v5e (16 MiB scoped default). For large
            # N*L: raise to 64-100 MiB on v5e/v6e; on v7x keep the working set
            # <= ~28 MiB and add an L/N grid axis with a K1-1 halo instead.
            vmem_limit_bytes=32 * 1024 * 1024,
        ),
    )(x_cnl, w_p, b_p)

    # (C_out_pad, n_cols_pad) -> (N, C_out, P_out)
    out = out2[:C_out, :n_cols].reshape(C_out, N, P_out)
    return jnp.transpose(out, (1, 0, 2))


def _reference(x, w, b, gamma, beta, K1, K2, eps=1e-5):
    """Pure-JAX f32 reference with PyTorch CNN1D semantics (training-mode BN)."""
    N, C_in, L = x.shape
    C_out = w.shape[0]
    mean = jnp.mean(x, axis=(0, 2), keepdims=True)
    var = jnp.mean((x - mean) ** 2, axis=(0, 2), keepdims=True)
    xbn = ((x - mean) * jax.lax.rsqrt(var + eps) * gamma.reshape(1, C_in, 1)
           + beta.reshape(1, C_in, 1))
    L_out = L - K1 + 1
    acc = jnp.zeros((N, C_out, L_out), jnp.float32)
    for k in range(K1):
        acc = acc + jnp.einsum('oc,ncl->nol', w[:, :, k], xbn[:, :, k:k + L_out])
    acc = jnp.maximum(acc + b.reshape(1, C_out, 1), 0.0)
    P_out = L_out // K2
    return jnp.max(acc[:, :, :P_out * K2].reshape(N, C_out, P_out, K2), axis=-1)


if __name__ == "__main__":
    in_channels = 4
    out_channels = 8
    kernel_size1 = 3
    kernel_size2 = 2

    batch = 2
    seq_len = 16

    key = jax.random.PRNGKey(0)
    kx, kw, kb = jax.random.split(key, 3)

    x = jax.random.normal(kx, (batch, in_channels, seq_len), dtype=jnp.float32)
    w = jax.random.normal(kw, (out_channels, in_channels, kernel_size1),
                          dtype=jnp.float32) * 0.1
    b = jax.random.normal(kb, (out_channels,), dtype=jnp.float32) * 0.1
    gamma = jnp.ones((in_channels,), dtype=jnp.float32)      # BN weight init
    beta = jnp.zeros((in_channels,), dtype=jnp.float32)      # BN bias init

    out = cnn1d_forward(x, w, b, gamma, beta,
                        kernel_size1=kernel_size1,
                        kernel_size2=kernel_size2)
    jax.block_until_ready(out)

    expected_len = (seq_len - kernel_size1 + 1) // kernel_size2
    assert out.shape == (batch, out_channels, expected_len), out.shape

    ref = _reference(x, w, b, gamma, beta, kernel_size1, kernel_size2)
    err = float(jnp.max(jnp.abs(out - ref)))
    assert err < 5e-2, f"max abs error vs reference: {err}"   # bf16-matmul tolerance

    print("KERNEL_OK")
</pallas_src>

<mosaic_0001>
module attributes {stable_mosaic.version = 11 : i64} {
  func.func @_cnn1d_kernel(%arg0: i32, %arg1: memref<4x2x16xbf16, #tpu.memory_space<vmem>>, %arg2: memref<8x3x4xbf16, #tpu.memory_space<vmem>>, %arg3: memref<8x1xf32, #tpu.memory_space<vmem>>, %arg4: memref<8x128xf32, #tpu.memory_space<vmem>>) attributes {dimension_semantics = [#tpu.dimension_semantics<parallel>], iteration_bounds = array<i64: 1>, scalar_prefetch = 0 : i64, scratch_operands = 0 : i64, tpu.core_type = #tpu.core_type<tc>, window_params = [{pipeline_mode = #tpu.pipeline_mode<synchronous>, transform_indices = @transform_0, window_bounds = array<i64: 4, 2, 16>}, {transform_indices = @transform_1, window_bounds = array<i64: 8, 3, 4>}, {transform_indices = @transform_2, window_bounds = array<i64: 8, 1>}, {transform_indices = @transform_3, window_bounds = array<i64: 8, 128>}]} {
    %c0 = arith.constant 0 : index
    %c0_0 = arith.constant 0 : index
    %c0_1 = arith.constant 0 : index
    %0 = vector.load %arg1[%c0, %c0_0, %c0_1] : memref<4x2x16xbf16, #tpu.memory_space<vmem>>, vector<4x2x16xbf16>
    %c0_2 = arith.constant 0 : index
    %c0_3 = arith.constant 0 : index
    %c0_4 = arith.constant 0 : index
    %1 = vector.load %arg2[%c0_2, %c0_3, %c0_4] : memref<8x3x4xbf16, #tpu.memory_space<vmem>>, vector<8x3x4xbf16>
    %cst = arith.constant 0.000000e+00 : f32
    %2 = vector.broadcast %cst : f32 to vector<8x28xf32>
    %3 = vector.extract_strided_slice %0 {offsets = [0, 0, 0], sizes = [4, 2, 14], strides = [1, 1, 1]} : vector<4x2x16xbf16> to vector<4x2x14xbf16>
    %4 = vector.shape_cast %3 : vector<4x2x14xbf16> to vector<4x28xbf16>
    %5 = vector.extract_strided_slice %1 {offsets = [0, 0, 0], sizes = [8, 1, 4], strides = [1, 1, 1]} : vector<8x3x4xbf16> to vector<8x1x4xbf16>
    %6 = vector.shape_cast %5 : vector<8x1x4xbf16> to vector<8x4xbf16>
    %cst_5 = arith.constant dense<0.000000e+00> : vector<8x28xf32>
    %7 = tpu.matmul %6, %4, %cst_5 {dimension_numbers = #tpu.dot_dimension_numbers<[1], [0], [0], [1], [0, 0, 1, 1], [], []>} : vector<8x4xbf16>, vector<4x28xbf16>, vector<8x28xf32> -> vector<8x28xf32>
    %8 = arith.addf %2, %7 : vector<8x28xf32>
    %9 = vector.extract_strided_slice %0 {offsets = [0, 0, 1], sizes = [4, 2, 14], strides = [1, 1, 1]} : vector<4x2x16xbf16> to vector<4x2x14xbf16>
    %10 = vector.shape_cast %9 : vector<4x2x14xbf16> to vector<4x28xbf16>
    %11 = vector.extract_strided_slice %1 {offsets = [0, 1, 0], sizes = [8, 1, 4], strides = [1, 1, 1]} : vector<8x3x4xbf16> to vector<8x1x4xbf16>
    %12 = vector.shape_cast %11 : vector<8x1x4xbf16> to vector<8x4xbf16>
    %cst_6 = arith.constant dense<0.000000e+00> : vector<8x28xf32>
    %13 = tpu.matmul %12, %10, %cst_6 {dimension_numbers = #tpu.dot_dimension_numbers<[1], [0], [0], [1], [0, 0, 1, 1], [], []>} : vector<8x4xbf16>, vector<4x28xbf16>, vector<8x28xf32> -> vector<8x28xf32>
    %14 = arith.addf %8, %13 : vector<8x28xf32>
    %15 = vector.extract_strided_slice %0 {offsets = [0, 0, 2], sizes = [4, 2, 14], strides = [1, 1, 1]} : vector<4x2x16xbf16> to vector<4x2x14xbf16>
    %16 = vector.shape_cast %15 : vector<4x2x14xbf16> to vector<4x28xbf16>
    %17 = vector.extract_strided_slice %1 {offsets = [0, 2, 0], sizes = [8, 1, 4], strides = [1, 1, 1]} : vector<8x3x4xbf16> to vector<8x1x4xbf16>
    %18 = vector.shape_cast %17 : vector<8x1x4xbf16> to vector<8x4xbf16>
    %cst_7 = arith.constant dense<0.000000e+00> : vector<8x28xf32>
    %19 = tpu.matmul %18, %16, %cst_7 {dimension_numbers = #tpu.dot_dimension_numbers<[1], [0], [0], [1], [0, 0, 1, 1], [], []>} : vector<8x4xbf16>, vector<4x28xbf16>, vector<8x28xf32> -> vector<8x28xf32>
    %20 = arith.addf %14, %19 : vector<8x28xf32>
    %c0_8 = arith.constant 0 : index
    %c0_9 = arith.constant 0 : index
    %21 = vector.load %arg3[%c0_8, %c0_9] : memref<8x1xf32, #tpu.memory_space<vmem>>, vector<8x1xf32>
    %22 = vector.broadcast %21 : vector<8x1xf32> to vector<8x28xf32>
    %23 = arith.addf %20, %22 : vector<8x28xf32>
    %cst_10 = arith.constant 0.000000e+00 : f32
    %24 = vector.broadcast %cst_10 : f32 to vector<8x28xf32>
    %25 = arith.maximumf %23, %24 : vector<8x28xf32>
    %26 = vector.shape_cast %25 : vector<8x28xf32> to vector<8x14x2xf32>
    %cst_11 = arith.constant dense<0xFF800000> : vector<8x14xf32>
    %27 = vector.multi_reduction <maximumf>, %26, %cst_11 [2] : vector<8x14x2xf32> to vector<8x14xf32>
    %cst_12 = arith.constant 0.000000e+00 : f32
    %28 = vector.broadcast %cst_12 : f32 to vector<8x114xf32>
    %29 = tpu.concatenate %27, %28 in 1 : vector<8x14xf32>, vector<8x114xf32> -> vector<8x128xf32>
    %c0_13 = arith.constant 0 : index
    %c0_14 = arith.constant 0 : index
    %30 = vector.load %arg4[%c0_13, %c0_14] : memref<8x128xf32, #tpu.memory_space<vmem>>, vector<8x128xf32>
    tpu.vector_store %arg4[%c0_13, %c0_14], %29 {strides = array<i32>} : memref<8x128xf32, #tpu.memory_space<vmem>>, vector<8x128xf32>,
    return
  }
  func.func @transform_0(%arg0: i32) -> (i32, i32, i32) {
    %c0_i32 = arith.constant 0 : i32
    %c0_i32_0 = arith.constant 0 : i32
    %c0_i32_1 = arith.constant 0 : i32
    %c0_i32_2 = arith.constant 0 : i32
    return %c0_i32, %c0_i32_0, %c0_i32_1 : i32, i32, i32
  }
  func.func @transform_1(%arg0: i32) -> (i32, i32, i32) {
    %c0_i32 = arith.constant 0 : i32
    %c0_i32_0 = arith.constant 0 : i32
    %c0_i32_1 = arith.constant 0 : i32
    return %arg0, %c0_i32, %c0_i32_0 : i32, i32, i32
  }
  func.func @transform_2(%arg0: i32) -> (i32, i32) {
    %c0_i32 = arith.constant 0 : i32
    %c0_i32_0 = arith.constant 0 : i32
    return %arg0, %c0_i32 : i32, i32
  }
  func.func @transform_3(%arg0: i32) -> (i32, i32) {
    %c0_i32 = arith.constant 0 : i32
    %c0_i32_0 = arith.constant 0 : i32
    return %arg0, %c0_i32 : i32, i32
  }
}

</mosaic_0001>

<bundles_post_ra>
// kernel: tpu_custom_call.1
= control target key start
LH: loop header
LB: loop body
LE: loop exit
PB: predicated region body
PF: predicated region fallthrough
CT: control target
= control target key end

     0   :  { %v44_v2 = vlaneseq  ;;  %s1017_s16 = smov 127   ;;  %s1332_s0 = inlined_call_operand.vmem [shape: bf16[4,2,16], index: 0, kind: input, shape index: {}]   ;;  %s1333_s1 = inlined_call_operand.vmem [shape: bf16[8,3,4], index: 1, kind: input, shape index: {}]   ;;  %s1334_s2 = inlined_call_operand.vmem [shape: f32[8,1], index: 2, kind: input, shape index: {}]   ;;  %s1335_s3 = inlined_call_operand.hbm [shape: f32[8,128], index: 3, kind: output, shape index: {}]  }
   0x1   :  { %v18_v0 = vld [vmem:[%s1332_s0 + $0x2] sm:$0x1]  ;;  %v16_v1 = vld [vmem:[%s1332_s0] sm:$0x1]  ;;  %v19_v5 = vld [vmem:[%s1332_s0 + $0x3] sm:$0x1] }
   0x2   :  { %84 = vrot.lane.b32.xlu1 %v18_v0, %s1017_s16  ;;  %v37_v3 = vshrl.u32 %v18_v0, 16  ;;  %80 = vrot.lane.b32.xlu0 %v16_v1, %s1017_s16  ;;  %v31_v4 = vshrl.u32 %v16_v1, 16  ;;  %v17_v6 = vld [vmem:[%s1332_s0 + $0x1] sm:$0x1]  ;;  %v38_v7 = vshrl.u32 %v19_v5, 16  ;;  %v36_v8 = vpack.i.b16 %v19_v5, %v18_v0 }
   0x3   :  { %v32_v9 = vshrl.u32 %v17_v6, 16  ;;  %v30_v10 = vpack.i.b16 %v17_v6, %v16_v1 }
   0x4   :  { %8 = vsyncpa [#allocation3], 0  ;;  %v1072_v11 = vshrl.u32 %v44_v2, 7  ;;  %v39_v12 = vpack.i.b16 %v38_v7, %v37_v3  ;;  %v1018_v15 = vmov 1966171168   ;;  %s1019_s0 = smov 126  }
   0x5   :  { %v33_v13 = vpack.i.b16 %v32_v9, %v31_v4  ;;  %v1074_v14 = vcombine.low %v30_v10, %v36_v8  ;;  %v42_v16 = vunpack.c.l.s4 %v1018_v15  ;;  %s1020_s21 = smov 14   ;;  %v936_v22 = vld.sshfl [vmem:[%s1333_s1] sm:$0x3 pattern:$0x76325410]  ;;  %vm208_vm0 = vcmask 1041409  }
   0x6   :  { %86 = vrot.lane.b32.xlu1 %v19_v5, %s1017_s16  ;;  %82 = vrot.lane.b32.xlu0 %v17_v6, %s1017_s16  ;;  %v937_v23 = vld.sshfl [vmem:[%s1333_s1 + $0x2] sm:$0x3 pattern:$0x76325410]  ;;  %v1092_v24 = vunpack.c.l.b16 %v936_v22  ;;  %vm211_vm1 = vcmask 1042434   ;;  %vm214_vm2 = vcmask 1043459  }
   0x7   :  { %v43_v17 = vunpack.c.0.s8 %v42_v16  ;;  %v55_v18 = vcombine.low %v33_v13, %v39_v12  ;;  %v938_v25 = vld.sshfl [vmem:[%s1333_s1 + $0x4] sm:$0x3 pattern:$0x76325410]  ;;  %v1100_v27 = vunpack.c.l.b16 %v937_v23  ;;  %v1021_v45 = vmov 0.0   ;;  %s1025_s12 = smov 120  }
   0x8   :  { %v939_v26 = vld.sshfl [vmem:[%s1333_s1 + $0x6] sm:$0x3 pattern:$0x76325410]  ;;  %v1102_v28 = vunpack.c.l.b16 %v938_v25  ;;  %v207_v29 = vrot.slane %v1092_v24, 1  ;;  %953 = vmatprep.subr.bf16.mxu0 %v1021_v45  ;;  %959 = vmatprep.subr.bf16.mxu1 %v1021_v45  ;;  %vm217_vm3 = vcmask 1044484  }
   0x9   :  { %v1077_v19 = vsub.s32 %v43_v17, %v1072_v11  ;;  %v940_v30 = vld.sshfl [vmem:[%s1333_s1 + $0x8] sm:$0x3 pattern:$0x76325410]  ;;  %v1108_v31 = vunpack.c.l.b16 %v939_v26  ;;  %v276_v43 = vrot.slane %v1100_v27, 7  ;;  %vm220_vm4 = vcmask 1045509  }
   0xa   :  { %338 = vrot.lane.b32.xlu1 %v17_v6, %s1019_s0  ;;  %336 = vrot.lane.b32.xlu0 %v16_v1, %s1019_s0  ;;  %v941_v32 = vld.sshfl [vmem:[%s1333_s1 + $0xa] sm:$0x3 pattern:$0x76325410]  ;;  %v1113_v33 = vunpack.c.l.b16 %v940_v30  ;;  %v209_v34 = vsel %vm208_vm0, %v1100_v27, %v207_v29  ;;  %v210_v35 = vrot.slane %v1102_v28, 7  ;;  %vm1022_vm5 = vmmov 0  }
   0xb   :  { %v62_v20 = vrot.slane %v55_v18, %v1077_v19  ;;  %v942_v38 = vld.sshfl [vmem:[%s1333_s1 + $0xc] sm:$0x3 pattern:$0x76325410]  ;;  %v1121_v39 = vunpack.c.l.b16 %v941_v32  ;;  %v213_v40 = vrot.slane %v1108_v31, 6  ;;  %v47_v42 = vrot.slane %v1074_v14, %v1077_v19  ;;  %955 = vmatprep.mubr.msk.bf16.mxu0 %vm1022_vm5, %v1021_v45  ;;  %961 = vmatprep.mubr.msk.bf16.mxu1 %vm1022_vm5, %v1021_v45  ;;  %s1026_s13 = smov 122  }
   0xc   :  { %v943_v46 = vld.sshfl [vmem:[%s1333_s1 + $0xe] sm:$0x3 pattern:$0x76325410]  ;;  %v1131_v47 = vunpack.c.l.b16 %v942_v38  ;;  %v212_v48 = vsel %vm211_vm1, %v210_v35, %v209_v34  ;;  %v216_v49 = vrot.slane %v1113_v33, 5  ;;  %vm223_vm6 = vcmask 1046534  }
   0xd   :  { %v69_v21 = vrot.slane %v62_v20, %v1077_v19  ;;  %v1136_v50 = vunpack.c.l.b16 %v943_v46  ;;  %v215_v51 = vsel %vm214_vm2, %v213_v40, %v212_v48  ;;  %v219_v52 = vrot.slane %v1121_v39, 4  ;;  %s1027_s14 = smov 116   ;;  %s1028_s15 = smov 118  }
   0xe   :  { %342 = vrot.lane.b32.xlu1 %v19_v5, %s1019_s0  ;;  %340 = vrot.lane.b32.xlu0 %v18_v0, %s1019_s0  ;;  %v218_v55 = vsel %vm217_vm3, %v216_v49, %v215_v51  ;;  %v222_v56 = vrot.slane %v1131_v47, 3  ;;  %vm226_vm7 = vcmask 1047559   ;;  %v277_v10 = vsel %vm208_vm0, %v276_v43, %v1092_v24  ;;  %s1029_s16 = smov 112   ;;  %s1030_s17 = smov 114  }
   0xf   :  { %v221_v61 = vsel %vm220_vm4, %v219_v52, %v218_v55  ;;  %v225_v62 = vrot.slane %v1136_v50, 2  ;;  %vm72_vm8 = vcmask 113664   ;;  %v278_v13 = vrot.slane %v1102_v28, 6  ;;  %s1031_s18 = smov 108   ;;  %s1032_s19 = smov 110  }
  0x10   :  { %v224_v3 = vsel %vm223_vm6, %v222_v56, %v221_v61  ;;  %v280_v14 = vrot.slane %v1108_v31, 5  ;;  %vm233_vm9 = vcmask 1041408   ;;  %v54_v16 = vrot.slane %v47_v42, %v1077_v19  ;;  %s1033_s20 = smov 104   ;;  %s1038_s22 = smov [#allocation2]  }
  0x11   :  { %v1152_v6 = vsel %vm226_vm7, %v225_v62, %v224_v3  ;;  %v282_v17 = vrot.slane %v1113_v33, 4  ;;  %v279_v22 = vsel %vm211_vm1, %v278_v13, %v277_v10  ;;  %v284_v23 = vrot.slane %v1121_v39, 3  ;;  %s928_s23 = sshll.u32 %s1038_s22, 4  ;;  %s929_s23 = int_to_ptr.vmem [resolvable:$true] %s928_s23 }
  0x12   :  { %70 = vrot.lane.b32.xlu1 %v69_v21, %s1020_s21  ;;  %v286_v25 = vrot.slane %v1131_v47, 2  ;;  %v281_v34 = vsel %vm214_vm2, %v280_v14, %v279_v22  ;;  %v288_v35 = vrot.slane %v1136_v50, 1  ;;  %v395_v42 = vrot.slane %v1108_v31, 7  ;;  %s995_s24 = scalar_lea.vmem %s929_s23, 128  ;;  %p1000_p1 = scmp.lt.s32.totalorder %s929_s23, %s929_s23 }
  0x13   :  { %vm229_vm10 = vcmask 31744   ;;  %v397_v48 = vrot.slane %v1113_v33, 6  ;;  %v399_v51 = vrot.slane %v1121_v39, 5  ;;  %v452_v39 = vld [vmem:[%s1334_s2] sm:$0xff]  ;;  %s1024_s2 = smov 124   ;;  %vm770_vm11 = vcmask 15360   ;;  %p996_p0 = scmp.ne.s32.totalorder %s929_s23, %s995_s24 }
  0x14   :  { %vm774_vm12 = vcmask 13312   ;;  %vm847_vm13 = vcmask 130112   ;;  %p1001_p2 = scmp.lt.s32.totalorder %s995_s24, %s995_s24 }
  0x16   :  { %p1002_p3 = por %p1001_p2, %p1000_p1 }
  0x18   :  { %p1003_p4 = pnand %p1002_p3, %p996_p0 }
  0x74   :  { %v85_v36 = vpop.permute.xlu1 %84  ;;  %v81_v37 = vpop.permute.xlu0 %80 }
  0x75   :  { %v97_v41 = vshrl.u32 %v85_v36, 16  ;;  %v91_v44 = vshrl.u32 %v81_v37, 16 }
  0x78   :  { %v87_v53 = vpop.permute.xlu1 %86  ;;  %v83_v54 = vpop.permute.xlu0 %82 }
  0x79   :  { %v96_v57 = vpack.i.b16 %v87_v53, %v85_v36  ;;  %v98_v58 = vshrl.u32 %v87_v53, 16  ;;  %v90_v59 = vpack.i.b16 %v83_v54, %v81_v37  ;;  %v92_v60 = vshrl.u32 %v83_v54, 16 }
  0x7a   :  { %v391_v36 = vrot.slane %v1092_v24, 2  ;;  %v392_v37 = vrot.slane %v1100_v27, 1  ;;  %v401_v54 = vrot.slane %v1131_v47, 4 }
  0x7b   :  { %v99_v63 = vpack.i.b16 %v98_v58, %v97_v41  ;;  %v93_v0 = vpack.i.b16 %v92_v60, %v91_v44  ;;  %v1148_v1 = vcombine.low %v90_v59, %v96_v57  ;;  %v283_v41 = vsel %vm217_vm3, %v282_v17, %v281_v34 }
  0x7c   :  { %v339_v4 = vpop.permute.xlu1 %338  ;;  %v337_v5 = vpop.permute.xlu0 %336  ;;  %v285_v44 = vsel %vm220_vm4, %v284_v23, %v283_v41  ;;  %v393_v46 = vsel %vm208_vm0, %v392_v37, %v391_v36  ;;  %v403_v57 = vrot.slane %v1136_v50, 3  ;;  %v1023_v60 = vmov 0  }
  0x7d   :  { %v115_v7 = vcombine.low %v93_v0, %v99_v63  ;;  %v348_v8 = vshrl.u32 %v339_v4, 16  ;;  %v346_v9 = vpack.i.b16 %v339_v4, %v337_v5  ;;  %v347_v12 = vshrl.u32 %v337_v5, 16  ;;  %993 = vset.pattern.permute.xlu1 %v1023_v60  ;;  %994 = vset.pattern.permute.xlu0 %v1023_v60 }
  0x7e   :  { %v287_v27 = vsel %vm223_vm6, %v286_v25, %v285_v44  ;;  %v394_v31 = vsel %vm211_vm1, %v1102_v28, %v393_v46  ;;  %455 = vperm.xlu1 %993, %v452_v39   ;;  %v107_v61 = vrot.slane %v1148_v1, %v1077_v19  ;;  %v228_v4 = vpack.c.b16 %v1152_v6, %v1152_v6 }
  0x7f   :  { %v122_v15 = vrot.slane %v115_v7, %v1077_v19  ;;  %v349_v18 = vpack.i.b16 %v348_v8, %v347_v12  ;;  %v289_v53 = vsel %vm226_vm7, %v288_v35, %v287_v27  ;;  %v396_v56 = vsel %vm214_vm2, %v395_v42, %v394_v31 }
  0x80   :  { %v343_v20 = vpop.permute.xlu1 %342  ;;  %v341_v21 = vpop.permute.xlu0 %340  ;;  %v290_v33 = vpack.c.b16 %v289_v53, %v289_v53  ;;  %v398_v58 = vsel %vm217_vm3, %v397_v48, %v396_v56  ;;  %v114_v62 = vrot.slane %v107_v61, %v1077_v19  ;;  %v1036_v35 = vmov 1983009808  }
  0x81   :  { %v354_v26 = vshrl.u32 %v343_v20, 16  ;;  %v352_v29 = vpack.i.b16 %v343_v20, %v341_v21  ;;  %v353_v30 = vshrl.u32 %v341_v21, 16  ;;  %v129_v32 = vrot.slane %v122_v15, %v1077_v19 }
  0x82   :  { %v400_v28 = vsel %vm220_vm4, %v399_v51, %v398_v58  ;;  %v503_v36 = vunpack.c.l.s4 %v1036_v35  ;;  %v1037_v41 = vmov 1934713408  }
  0x83   :  { %v355_v38 = vpack.i.b16 %v354_v26, %v353_v30  ;;  %v356_v40 = vcombine.low %v346_v9, %v352_v29  ;;  %130 = vrot.lane.b32.xlu0 %v129_v32, %s1020_s21  ;;  %v402_v47 = vsel %vm223_vm6, %v401_v54, %v400_v28  ;;  %v567_v42 = vunpack.c.l.s4 %v1037_v41 }
  0x84   :  { %v71_v43 = vpop.permute.xlu1 %70  ;;  %v404_v50 = vsel %vm226_vm7, %v403_v57, %v402_v47 }
  0x85   :  { %v371_v49 = vcombine.low %v349_v18, %v355_v38  ;;  %v75_v24 = vsel %vm72_vm8, %v54_v16, %v71_v43  ;;  %v363_v5 = vrot.slane %v356_v40, %v1077_v19  ;;  %v405_v10 = vpack.c.b16 %v404_v50, %v404_v50 }
  0x86   :  { %v294_v52 = vsel %vm233_vm9, %v75_v24, 0  ;;  %v504_v40 = vunpack.c.0.s8 %v503_v36  ;;  %v568_v27 = vunpack.c.0.s8 %v567_v42 }
  0x87   :  { %v378_v55 = vrot.slane %v371_v49, %v1077_v19  ;;  %960 = vmatpush3.bf16.msra.mxu1 %v294_v52  ;;  %v370_v7 = vrot.slane %v363_v5, %v1077_v19 }
  0x88   :  { %v1241_v48 = vsub.s32 %v504_v40, %v1072_v11  ;;  %v1254_v56 = vsub.s32 %v568_v27, %v1072_v11 }
  0x89   :  { %v385_v59 = vrot.slane %v378_v55, %v1077_v19 }
  0x8a   :  { %962 = vmatmul.mubr.msk.bf16.vlgmr.msra.gmra.mxu1 %vm229_vm10, %v290_v33 }
  0x8b   :  { %386 = vrot.lane.b32.xlu0 %v385_v59, %s1020_s21  ;;  %s1035_s21 = smov 102  }
  0xf5   :  { %v131_v63 = vpop.permute.xlu0 %130 }
  0xf6   :  { %v134_v0 = vsel %vm72_vm8, %v114_v62, %v131_v63 }
  0xf7   :  { %v234_v3 = vsel %vm233_vm9, %v134_v0, 0 }
  0xf8   :  { %954 = vmatpush3.bf16.msra.mxu0 %v234_v3 }
  0xf9   :  { %965 = vmatprep.subr.bf16.mxu0 %v1021_v45  ;;  %v456_v21 = vpop.permute.xlu1 %455 }
  0xfb   :  { %956 = vmatmul.mubr.msk.bf16.vlgmr.msra.gmra.mxu0 %vm229_vm10, %v228_v4 }
  0xfc   :  { %967 = vmatprep.mubr.msk.bf16.mxu0 %vm1022_vm5, %v1021_v45 }
  0xfd   :  { %v387_v1 = vpop.permute.xlu0 %386 }
  0xfe   :  { %v390_v8 = vsel %vm72_vm8, %v370_v7, %v387_v1 }
  0xff   :  { %v409_v9 = vsel %vm233_vm9, %v390_v8, 0 }
 0x100   :  { %966 = vmatpush3.bf16.msra.mxu0 %v409_v9 }
 0x103   :  { %968 = vmatmul.mubr.msk.bf16.vlgmr.msra.gmra.mxu0 %vm229_vm10, %v405_v10 }
 0x14a   :  { %v330_v6 = vpop.f32.mrf.mxu1 }
 0x14c   :  { %v963_v12 = vpop.f32.mrf.mxu1 }
 0x14e   :  { %v333_v13 = vpop.f32.mrf.mxu1 }
 0x150   :  { %v964_v14 = vpop.f32.mrf.mxu1 }
 0x1bb   :  { %v270_v15 = vpop.f32.mrf.mxu0 }
 0x1bc   :  { %v331_v18 = vadd.f32 %v330_v6, %v270_v15 }
 0x1bd   :  { %v957_v16 = vpop.f32.mrf.mxu0 }
 0x1bf   :  { %v273_v17 = vpop.f32.mrf.mxu0 }
 0x1c1   :  { %v958_v19 = vpop.f32.mrf.mxu0 }
 0x1c3   :  { %v445_v20 = vpop.f32.mrf.mxu0 }
 0x1c4   :  { %v451_v22 = vadd.f32 %v445_v20, %v331_v18 }
 0x1c5   :  { %v969_v23 = vpop.f32.mrf.mxu0 }
 0x1c6   :  { %v458_v25 = vadd.f32 %v456_v21, %v451_v22 }
 0x1c7   :  { %v448_v26 = vpop.f32.mrf.mxu0 }
 0x1c8   :  { %v1212_v29 = vmax.f32 %v458_v25, 0.0 }
 0x1c9   :  { %v970_v30 = vpop.f32.mrf.mxu0 }
 0x1ca   :  { %464 = vrot.lane.b32.xlu1 %v1212_v29, %s1024_s2  ;;  %461 = vrot.lane.b32.xlu0 %v1212_v29, %s1019_s0  ;;  %s1034_s0 = smov 106  }
 0x1ce   :  { %470 = vrot.lane.b32.xlu1 %v1212_v29, %s1025_s12  ;;  %467 = vrot.lane.b32.xlu0 %v1212_v29, %s1026_s13 }
 0x1d2   :  { %476 = vrot.lane.b32.xlu1 %v1212_v29, %s1027_s14  ;;  %473 = vrot.lane.b32.xlu0 %v1212_v29, %s1028_s15 }
 0x1d6   :  { %482 = vrot.lane.b32.xlu1 %v1212_v29, %s1029_s16  ;;  %479 = vrot.lane.b32.xlu0 %v1212_v29, %s1030_s17 }
 0x1da   :  { %488 = vrot.lane.b32.xlu1 %v1212_v29, %s1031_s18  ;;  %485 = vrot.lane.b32.xlu0 %v1212_v29, %s1032_s19 }
 0x1de   :  { %494 = vrot.lane.b32.xlu1 %v1212_v29, %s1033_s20  ;;  %491 = vrot.lane.b32.xlu0 %v1212_v29, %s1034_s0 }
 0x1e2   :  { %497 = vrot.lane.b32.xlu0 %v1212_v29, %s1035_s21 }
 0x23c   :  { %v1228_v32 = vpop.permute.xlu1 %464  ;;  %v1230_v34 = vpop.permute.xlu0 %461 }
 0x23d   :  { %v500_v49 = vcombine.low %v1212_v29, %v1228_v32  ;;  %v501_v15 = vcombine.high %v1212_v29, %v1228_v32 }
 0x23f   :  { %v508_v54 = vrot.slane %v500_v49, %v1241_v48  ;;  %v515_v27 = vrot.slane %v501_v15, %v1241_v48 }
 0x240   :  { %v1232_v37 = vpop.permute.xlu1 %470  ;;  %v1234_v38 = vpop.permute.xlu0 %467 }
 0x241   :  { %v516_v43 = vcombine.low %v1230_v34, %v1234_v38 }
 0x243   :  { %v1248_v51 = vrot.slane %v516_v43, %v1241_v48 }
 0x244   :  { %v1238_v44 = vpop.permute.xlu1 %476  ;;  %v474_v46 = vpop.permute.xlu0 %473 }
 0x245   :  { %v532_v24 = vcombine.low %v1232_v37, %v1238_v44  ;;  %v564_v57 = vcombine.low %v508_v54, %v1248_v51  ;;  %v565_v23 = vcombine.high %v508_v54, %v1248_v51  ;;  %v533_v25 = vcombine.high %v1232_v37, %v1238_v44 }
 0x247   :  { %v540_v55 = vrot.slane %v532_v24, %v1241_v48  ;;  %v572_v50 = vrot.slane %v564_v57, %v1254_v56  ;;  %v579_v49 = vrot.slane %v565_v23, %v1254_v56 }
 0x248   :  { %v483_v52 = vpop.permute.xlu1 %482  ;;  %v480_v53 = vpop.permute.xlu0 %479 }
 0x249   :  { %v548_v31 = vcombine.low %v474_v46, %v480_v53  ;;  %v549_v16 = vcombine.high %v474_v46, %v480_v53  ;;  %v547_v46 = vrot.slane %v533_v25, %v1241_v48 }
 0x24b   :  { %v556_v33 = vrot.slane %v548_v31, %v1241_v48  ;;  %v563_v36 = vrot.slane %v549_v16, %v1241_v48 }
 0x24c   :  { %v486_v39 = vpop.permute.xlu0 %485  ;;  %v489_v59 = vpop.permute.xlu1 %488 }
 0x24d   :  { %v596_v58 = vcombine.low %v540_v55, %v556_v33  ;;  %v636_v60 = vcombine.low %v483_v52, %v489_v59  ;;  %v597_v17 = vcombine.high %v540_v55, %v556_v33  ;;  %v637_v19 = vcombine.high %v483_v52, %v489_v59 }
 0x24e   :  { %v612_v51 = vcombine.low %v547_v46, %v563_v36 }
 0x24f   :  { %v604_v28 = vrot.slane %v596_v58, %v1254_v56  ;;  %v644_v3 = vrot.slane %v636_v60, %v1241_v48  ;;  %v651_v40 = vrot.slane %v637_v19, %v1241_v48 }
 0x250   :  { %v492_v47 = vpop.permute.xlu0 %491  ;;  %v495_v63 = vpop.permute.xlu1 %494  ;;  %v620_v58 = vrot.slane %v612_v51, %v1254_v56 }
 0x251   :  { %v652_v61 = vcombine.low %v486_v39, %v492_v47  ;;  %v628_v62 = vcombine.low %v572_v50, %v604_v28  ;;  %v675_v7 = vrot.slane %v495_v63, %v1241_v48  ;;  %v668_v10 = vcombine.high %v495_v63, %v1021_v45 }
 0x252   :  { %v653_v6 = vcombine.high %v486_v39, %v492_v47  ;;  %v629_v41 = vcombine.high %v572_v50, %v604_v28 }
 0x253   :  { %v660_v0 = vrot.slane %v652_v61, %v1241_v48  ;;  %v771_v4 = vsel %vm770_vm11, %v628_v62, -inf  ;;  %v682_v26 = vrot.slane %v668_v10, %v1241_v48  ;;  %v613_v61 = vcombine.high %v547_v46, %v563_v36 }
 0x254   :  { %v498_v5 = vpop.permute.xlu0 %497  ;;  %772 = vmax.xlane.f32.xlu1 %v771_v4  ;;  %v667_v29 = vrot.slane %v653_v6, %v1241_v48  ;;  %v778_v31 = vsel %vm770_vm11, %v629_v41, -inf }
 0x255   :  { %v698_v1 = vcombine.low %v644_v3, %v660_v0  ;;  %v683_v8 = vcombine.high %v498_v5, %v1021_v45  ;;  %v690_v9 = vrot.slane %v498_v5, %v1241_v48  ;;  %v699_v12 = vcombine.high %v644_v3, %v660_v0 }
 0x256   :  { %v517_v45 = vcombine.high %v1230_v34, %v1234_v38  ;;  %v611_v34 = vrot.slane %v597_v17, %v1254_v56  ;;  %v714_v24 = vcombine.low %v651_v40, %v667_v29  ;;  %v715_v50 = vcombine.high %v651_v40, %v667_v29 }
 0x257   :  { %v730_v13 = vcombine.low %v675_v7, %v690_v9  ;;  %v731_v14 = vcombine.high %v675_v7, %v690_v9  ;;  %v697_v18 = vrot.slane %v683_v8, %v1241_v48  ;;  %v706_v20 = vrot.slane %v698_v1, %v1254_v56 }
 0x258   :  { %v713_v35 = vrot.slane %v699_v12, %v1254_v56  ;;  %v531_v44 = vrot.slane %v517_v45, %v1241_v48  ;;  %v630_v52 = vcombine.low %v579_v49, %v611_v34  ;;  %v722_v57 = vrot.slane %v714_v24, %v1254_v56 }
 0x259   :  { %v738_v21 = vrot.slane %v730_v13, %v1254_v56  ;;  %v745_v22 = vrot.slane %v731_v14, %v1254_v56  ;;  %v746_v38 = vcombine.low %v682_v26, %v697_v18  ;;  %v631_v39 = vcombine.high %v579_v49, %v611_v34 }
 0x25a   :  { %v580_v33 = vcombine.low %v515_v27, %v531_v44  ;;  %v747_v59 = vcombine.high %v682_v26, %v697_v18  ;;  %v784_v28 = vsel %vm770_vm11, %v630_v52, -inf  ;;  %v581_v5 = vcombine.high %v515_v27, %v531_v44 }
 0x25b   :  { %v763_v30 = vcombine.high %v706_v20, %v738_v21  ;;  %v762_v32 = vcombine.low %v706_v20, %v738_v21  ;;  %v764_v43 = vcombine.low %v713_v35, %v745_v22  ;;  %v765_v54 = vcombine.high %v713_v35, %v745_v22 }
 0x25c   :  { %v754_v55 = vrot.slane %v746_v38, %v1254_v56  ;;  %v588_v47 = vrot.slane %v580_v33, %v1254_v56  ;;  %v790_v63 = vsel %vm770_vm11, %v631_v39, -inf  ;;  %v761_v4 = vrot.slane %v747_v59, %v1254_v56 }
 0x25d   :  { %v781_v42 = vsel %vm774_vm12, %v763_v30, -inf  ;;  %v775_v37 = vsel %vm774_vm12, %v762_v32, -inf  ;;  %v787_v53 = vsel %vm774_vm12, %v764_v43, -inf  ;;  %v793_v48 = vsel %vm774_vm12, %v765_v54, -inf }
 0x25e   :  { %782 = vmax.xlane.f32.xlu1 %v781_v42  ;;  %776 = vmax.xlane.f32.xlu0 %v775_v37  ;;  %v766_v60 = vcombine.low %v722_v57, %v754_v55  ;;  %v632_v62 = vcombine.low %v588_v47, %v620_v58  ;;  %v767_v3 = vcombine.high %v722_v57, %v754_v55  ;;  %v837_v29 = vand.u32 127, %v44_v2 }
 0x25f   :  { %v729_v7 = vrot.slane %v715_v50, %v1254_v56  ;;  %v627_v1 = vrot.slane %v613_v61, %v1254_v56  ;;  %v633_v10 = vcombine.high %v588_v47, %v620_v58  ;;  %v595_v12 = vrot.slane %v581_v5, %v1254_v56 }
 0x260   :  { %v799_v0 = vsel %vm774_vm12, %v766_v60, -inf  ;;  %v796_v8 = vsel %vm770_vm11, %v632_v62, -inf  ;;  %v805_v9 = vsel %vm774_vm12, %v767_v3, -inf  ;;  %v842_v35 = vadd.s32 4294967288, %v837_v29 }
 0x261   :  { %v768_v6 = vcombine.low %v729_v7, %v761_v4  ;;  %v802_v13 = vsel %vm770_vm11, %v633_v10, -inf  ;;  %v634_v15 = vcombine.low %v595_v12, %v627_v1  ;;  %v769_v16 = vcombine.high %v729_v7, %v761_v4 }
 0x262   :  { %788 = vmax.xlane.f32.xlu1 %v787_v53  ;;  %779 = vmax.xlane.f32.xlu0 %v778_v31  ;;  %v635_v18 = vcombine.high %v595_v12, %v627_v1  ;;  %v840_v41 = vsub.s32 %v837_v29, %v1072_v11  ;;  %v845_v34 = vsub.s32 %v842_v35, %v1072_v11 }
 0x263   :  { %v811_v14 = vsel %vm774_vm12, %v768_v6, -inf  ;;  %v808_v17 = vsel %vm770_vm11, %v634_v15, -inf  ;;  %v817_v19 = vsel %vm774_vm12, %v769_v16, -inf }
 0x264   :  { %v814_v20 = vsel %vm770_vm11, %v635_v18, -inf }
 0x266   :  { %794 = vmax.xlane.f32.xlu1 %v793_v48  ;;  %785 = vmax.xlane.f32.xlu0 %v784_v28 }
 0x26a   :  { %791 = vmax.xlane.f32.xlu0 %v790_v63  ;;  %800 = vmax.xlane.f32.xlu1 %v799_v0 }
 0x26e   :  { %797 = vmax.xlane.f32.xlu0 %v796_v8  ;;  %806 = vmax.xlane.f32.xlu1 %v805_v9 }
 0x272   :  { %803 = vmax.xlane.f32.xlu0 %v802_v13  ;;  %812 = vmax.xlane.f32.xlu1 %v811_v14 }
 0x276   :  { %809 = vmax.xlane.f32.xlu0 %v808_v17  ;;  %818 = vmax.xlane.f32.xlu1 %v817_v19 }
 0x27a   :  { %815 = vmax.xlane.f32.xlu0 %v814_v20 }
 0x2dd   :  { %v773_v21 = vpop.xlane.xlu1 %772 }
 0x2de   :  { %v841_v2 = vrot.slane %v773_v21, %v840_v41 }
 0x2e7   :  { %v783_v56 = vpop.xlane.xlu1 %782  ;;  %v777_v22 = vpop.xlane.xlu0 %776 }
 0x2e8   :  { %v856_v44 = vrot.slane %v783_v56, %v845_v34  ;;  %v846_v46 = vrot.slane %v777_v22, %v845_v34 }
 0x2ea   :  { %v848_v11 = vsel %vm847_vm13, %v846_v46, %v841_v2 }
 0x2eb   :  { %v789_v45 = vpop.xlane.xlu1 %788  ;;  %v780_v23 = vpop.xlane.xlu0 %779 }
 0x2ec   :  { %v852_v38 = vrot.slane %v780_v23, %v840_v41  ;;  %v865_v24 = vrot.slane %v789_v45, %v845_v34 }
 0x2ee   :  { %v857_v51 = vsel %vm847_vm13, %v856_v44, %v852_v38 }
 0x2ef   :  { %v795_v25 = vpop.xlane.xlu1 %794  ;;  %v786_v26 = vpop.xlane.xlu0 %785  ;;  %v912_v58 = vsel %vm208_vm0, %v857_v51, %v848_v11 }
 0x2f0   :  { %v861_v42 = vrot.slane %v786_v26, %v840_v41  ;;  %v874_v52 = vrot.slane %v795_v25, %v845_v34 }
 0x2f2   :  { %v866_v31 = vsel %vm847_vm13, %v865_v24, %v861_v42 }
 0x2f3   :  { %v792_v30 = vpop.xlane.xlu0 %791  ;;  %v801_v32 = vpop.xlane.xlu1 %800  ;;  %v913_v60 = vsel %vm211_vm1, %v866_v31, %v912_v58 }
 0x2f4   :  { %v870_v49 = vrot.slane %v792_v30, %v840_v41  ;;  %v883_v54 = vrot.slane %v801_v32, %v845_v34 }
 0x2f6   :  { %v875_v33 = vsel %vm847_vm13, %v874_v52, %v870_v49 }
 0x2f7   :  { %v798_v36 = vpop.xlane.xlu0 %797  ;;  %v807_v40 = vpop.xlane.xlu1 %806  ;;  %v914_v50 = vsel %vm214_vm2, %v875_v33, %v913_v60 }
 0x2f8   :  { %v879_v27 = vrot.slane %v798_v36, %v840_v41  ;;  %v892_v57 = vrot.slane %v807_v40, %v845_v34 }
 0x2fa   :  { %v884_v59 = vsel %vm847_vm13, %v883_v54, %v879_v27 }
 0x2fb   :  { %v804_v37 = vpop.xlane.xlu0 %803  ;;  %v813_v43 = vpop.xlane.xlu1 %812  ;;  %v915_v63 = vsel %vm217_vm3, %v884_v59, %v914_v50 }
 0x2fc   :  { %v888_v53 = vrot.slane %v804_v37, %v840_v41  ;;  %v901_v48 = vrot.slane %v813_v43, %v845_v34 }
 0x2fe   :  { %v893_v47 = vsel %vm847_vm13, %v892_v57, %v888_v53 }
 0x2ff   :  { %v810_v55 = vpop.xlane.xlu0 %809  ;;  %v819_v28 = vpop.xlane.xlu1 %818  ;;  %v916_v4 = vsel %vm220_vm4, %v893_v47, %v915_v63 }
 0x300   :  { %v897_v39 = vrot.slane %v810_v55, %v840_v41  ;;  %v910_v0 = vrot.slane %v819_v28, %v845_v34 }
 0x302   :  { %v902_v61 = vsel %vm847_vm13, %v901_v48, %v897_v39 }
 0x303   :  { %v816_v62 = vpop.xlane.xlu0 %815  ;;  %v917_v7 = vsel %vm223_vm6, %v902_v61, %v916_v4 }
 0x304   :  { %v906_v3 = vrot.slane %v816_v62, %v840_v41 }
 0x306   :  { %v911_v5 = vsel %vm847_vm13, %v910_v0, %v906_v3 }
 0x307   :  { %v918_v1 = vsel %vm226_vm7, %v911_v5, %v917_v7 }
 0x308   :  { %v920_v8 = vsel %vm72_vm8, %v918_v1, 0.0 }
 0x309   :  { %921 = vst [vmem:[#allocation2] sm:$0xff] %v920_v8 }
 0x30a   :  { %1006 = shalt.err (!%p1003_p4)
}
 0x30b   :  { %931 = dma.vmem_to_hbm [thread:$0]  %s929_s23, 128, %s1335_s3, [#allocation3]  }
 0x30c   :  { %1015 = dma.done.wait [#allocation3], 128  }
 0x30d   :  { %1016 = vsyncadd [#allocation3], 4294967168 }
 0x30e   :  { %935 = vsyncpa [#allocation3], 1 }

</bundles_post_ra>
